<compile_context>
chip_gen: v6e
topology: v6e:2x2x1
jax: 0.10.0
libtpu: 0.0.40
codegen_flags: <defaults>
</compile_context>

<pallas_src>
import functools

import jax
import jax.numpy as jnp
from jax import lax
from jax.experimental import pallas as pl
from jax.experimental.pallas import tpu as pltpu

_MIB = 1024 * 1024


def _round_down(x, m):
    return (x // m) * m


def _round_up(x, m):
    return ((x + m - 1) // m) * m


def _focal_loss_kernel(logits_ref, tgt_ref, alpha_ref, out_ref, *,
                       gamma, n_total, tile_n):
    # In-kernel upcast: narrow dtypes (bf16/f16) stream from HBM at native width.
    logits = logits_ref[...].astype(jnp.float32)            # (TILE_N, C)
    tgt = tgt_ref[...]                                       # (TILE_N, 1) int32
    alpha = alpha_ref[...]                                   # (1, C) float32
    tn, c = logits.shape

    # Boolean target mask: compare + select instead of a materialized f32 one-hot
    # (drops the int->f32 convert and one multiply per element -> fewer VALU slots).
    class_ids = lax.broadcasted_iota(jnp.int32, (tn, c), 1)
    tgt_mask = class_ids == tgt                              # (TILE_N, C) bool

    # Numerically-stable log-softmax evaluated at the target class.
    m = jnp.max(logits, axis=-1, keepdims=True)              # (TILE_N, 1)
    shifted = logits - m
    lse = jnp.log(jnp.sum(jnp.exp(shifted), axis=-1, keepdims=True))
    tgt_shifted = jnp.sum(jnp.where(tgt_mask, shifted, 0.0),
                          axis=-1, keepdims=True)
    logp_t = tgt_shifted - lse

    ce = -logp_t                                             # unweighted CE per sample
    p_t = jnp.exp(logp_t)                                    # == exp(-ce)
    alpha_t = jnp.sum(jnp.where(tgt_mask, alpha, 0.0), axis=-1, keepdims=True)
    ce_w = alpha_t * ce                                      # weighted CE, reduction='none'

    # Clamp so a numerically-tiny p_t > 1 never yields NaN for fractional gamma.
    base = jnp.maximum(1.0 - p_t, 0.0)
    if float(gamma).is_integer() and gamma >= 0:
        g = int(gamma)
        # Integer gamma (default 2.0): repeated VPU multiply, no EUP log+exp pow.
        w = jnp.ones_like(base) if g == 0 else base
        for _ in range(max(0, g - 1)):
            w = w * base
    else:
        w = base ** jnp.float32(gamma)
    focal = w * ce_w                                         # (TILE_N, 1)

    # NOTE: the tail mask is applied to `focal` (NOT to the inputs) and BEFORE the
    # tile reduction.  Rows past n_total in the last tile hold undefined data
    # (possibly NaN); jnp.where selects 0.0 for them so they contribute nothing.
    # Keep the mask exactly here if refactoring.
    row_ids = pl.program_id(0) * tile_n + lax.broadcasted_iota(
        jnp.int32, (tn, 1), 0)
    focal = jnp.where(row_ids < n_total, focal, 0.0)

    partial = jnp.sum(focal)                                 # scalar partial sum
    # Lane-dense, (8,128)-aligned per-tile output slab; wrapper sums lane [0,0].
    out_ref[...] = jnp.broadcast_to(partial, out_ref.shape)


def _vmem_bytes_per_row(c, itemsize):
    """VMEM bytes consumed per batch row, counting what actually lands in VMEM."""
    c_pad = _round_up(c, 128)                  # last dim pads to 128 lanes
    return (2 * c_pad * itemsize               # logits pipeline buffer, double-buffered
            + 2 * 128 * 4                      # (TILE_N,1) int32 targets pad to 128 lanes, x2
            + 4 * c_pad * 4)                   # ~4 tile-sized f32 body temporaries


def _pick_tile_n(n, c, itemsize):
    """Byte-based TILE_N (no fixed row cap): ~2-8 MiB per logits pipeline buffer,
    total plan <= ~40 MiB so the same plan is safe on v7x's 64 MiB VMEM."""
    c_pad = _round_up(c, 128)
    tile_from_total = (40 * _MIB) // _vmem_bytes_per_row(c, itemsize)
    tile_from_logits = (8 * _MIB) // (c_pad * itemsize)
    t = int(min(tile_from_total, tile_from_logits))
    return max(8, _round_down(t, 8))


def focal_loss(outputs, targets, alpha, gamma=2.0, tile_n=None):
    """outputs: (N, C) logits (any float dtype), targets: (N,) int labels,
    alpha: (C,) per-class weights.  Returns the scalar focal loss (f32)."""
    n, c = outputs.shape
    itemsize = jnp.dtype(outputs.dtype).itemsize

    if tile_n is None:
        tile_n = _pick_tile_n(n, c, itemsize)
        # Keep >= 2 tiles when the batch allows it so the "parallel" grid axis
        # can feed both of v7x's TensorCores (neutral on single-TC v5e/v6e).
        if n > 16:
            tile_n = min(tile_n, _round_up(pl.cdiv(n, 2), 8))
    if tile_n >= n:
        tile_n = n                       # single block == full array dim (always legal)
    else:
        tile_n = max(8, _round_down(int(tile_n), 8))
    num_tiles = pl.cdiv(n, tile_n)

    targets_2d = targets.astype(jnp.int32).reshape(n, 1)
    alpha_2d = alpha.astype(jnp.float32).reshape(1, c)

    kernel = functools.partial(_focal_loss_kernel, gamma=float(gamma),
                               n_total=n, tile_n=tile_n)

    # Scoped-VMEM limit sized to the actual tile plan (with headroom), clamped to
    # 48 MiB so it always fits v7x's 64 MiB physical VMEM (raises v5e's 16 MiB /
    # v6e's 32 MiB defaults when the plan needs it).
    c_pad = _round_up(c, 128)
    plan_bytes = (tile_n * _vmem_bytes_per_row(c, itemsize)
                  + 2 * 8 * 128 * 4            # output slab, double-buffered
                  + 2 * c_pad * 4)             # replicated alpha
    vmem_limit = int(min(48 * _MIB, max(32 * _MIB, plan_bytes * 5 // 4)))

    cost = pl.CostEstimate(
        flops=8 * n * c,
        transcendentals=n * c + 2 * n,
        bytes_accessed=n * c * itemsize + n * 4 + c * 4 + num_tiles * 8 * 128 * 4,
    )

    partials = pl.pallas_call(
        kernel,
        out_shape=jax.ShapeDtypeStruct((num_tiles, 8, 128), jnp.float32),
        grid=(num_tiles,),
        in_specs=[
            pl.BlockSpec((tile_n, c), lambda i: (i, 0)),   # logits tile
            pl.BlockSpec((tile_n, 1), lambda i: (i, 0)),   # targets tile
            pl.BlockSpec((1, c), lambda i: (0, 0)),        # alpha (replicated)
        ],
        out_specs=pl.BlockSpec((1, 8, 128), lambda i: (i, 0, 0)),
        compiler_params=pltpu.CompilerParams(
            dimension_semantics=("parallel",),             # lets v7x split tiles over 2 TCs
            vmem_limit_bytes=vmem_limit),
        cost_estimate=cost,
    )(outputs, targets_2d, alpha_2d)

    # Tiny final reduction + mean in the wrapper (divisor is the true N).
    return jnp.sum(partials[:, 0, 0]) * (1.0 / n)


def _focal_loss_ref(outputs, targets, alpha, gamma=2.0):
    """Pure-JAX reference mirroring torch.nn.functional.cross_entropy semantics."""
    logp = jax.nn.log_softmax(outputs.astype(jnp.float32), axis=-1)
    logp_t = jnp.take_along_axis(logp, targets[:, None], axis=-1)[:, 0]
    ce = -logp_t
    p_t = jnp.exp(-ce)
    ce_w = alpha.astype(jnp.float32)[targets] * ce
    return jnp.mean((1.0 - p_t) ** gamma * ce_w)


if __name__ == "__main__":
    key = jax.random.PRNGKey(0)
    k1, k2, k3, k4, k5 = jax.random.split(key, 5)
    gamma = 2.0

    # --- Small case matching the module's typical use (batch=8, classes=16) ---
    N, C = 8, 16
    outputs = jax.random.normal(k1, (N, C), dtype=jnp.float32)
    targets = jax.random.randint(k2, (N,), 0, C, dtype=jnp.int32)
    alpha = jax.random.uniform(k3, (C,), dtype=jnp.float32, minval=0.5, maxval=1.5)

    loss = jax.block_until_ready(focal_loss(outputs, targets, alpha, gamma))
    ref = _focal_loss_ref(outputs, targets, alpha, gamma)
    assert jnp.allclose(loss, ref, rtol=1e-5, atol=1e-5), (loss, ref)

    # --- Multi-tile + tail-masking path (N not a multiple of the tile) ---
    N2 = 200
    outputs2 = jax.random.normal(k4, (N2, C), dtype=jnp.float32)
    targets2 = jax.random.randint(k5, (N2,), 0, C, dtype=jnp.int32)
    loss2 = jax.block_until_ready(
        focal_loss(outputs2, targets2, alpha, gamma, tile_n=64))
    ref2 = _focal_loss_ref(outputs2, targets2, alpha, gamma)
    assert jnp.allclose(loss2, ref2, rtol=1e-5, atol=1e-5), (loss2, ref2)

    # --- Auto tile sizing path (byte-based, forced >=2 tiles) ---
    loss2b = jax.block_until_ready(focal_loss(outputs2, targets2, alpha, gamma))
    assert jnp.allclose(loss2b, ref2, rtol=1e-5, atol=1e-5), (loss2b, ref2)

    # --- Native-dtype (bf16) path: logits stay bf16 in HBM, upcast in-kernel ---
    loss3 = jax.block_until_ready(
        focal_loss(outputs2.astype(jnp.bfloat16), targets2, alpha, gamma, tile_n=64))
    ref3 = _focal_loss_ref(outputs2.astype(jnp.bfloat16), targets2, alpha, gamma)
    assert jnp.allclose(loss3, ref3, rtol=1e-4, atol=1e-4), (loss3, ref3)

    print("KERNEL_OK")
</pallas_src>

<mosaic_0001>
module attributes {stable_mosaic.version = 11 : i64} {
  func.func @_focal_loss_kernel(%arg0: i32, %arg1: memref<8x16xf32, #tpu.memory_space<vmem>>, %arg2: memref<8x1xi32, #tpu.memory_space<vmem>>, %arg3: memref<1x16xf32, #tpu.memory_space<vmem>>, %arg4: memref<1x8x128xf32, #tpu.memory_space<vmem>>) attributes {dimension_semantics = [#tpu.dimension_semantics<parallel>], iteration_bounds = array<i64: 1>, scalar_prefetch = 0 : i64, scratch_operands = 0 : i64, tpu.core_type = #tpu.core_type<tc>, window_params = [{transform_indices = @transform_0, window_bounds = array<i64: 8, 16>}, {transform_indices = @transform_1, window_bounds = array<i64: 8, 1>}, {pipeline_mode = #tpu.pipeline_mode<synchronous>, transform_indices = @transform_2, window_bounds = array<i64: 1, 16>}, {transform_indices = @transform_3, window_bounds = array<i64: 1, 8, 128>}]} {
    %c0 = arith.constant 0 : index
    %c0_0 = arith.constant 0 : index
    %0 = vector.load %arg1[%c0, %c0_0] : memref<8x16xf32, #tpu.memory_space<vmem>>, vector<8x16xf32>
    %c0_1 = arith.constant 0 : index
    %c0_2 = arith.constant 0 : index
    %1 = vector.load %arg2[%c0_1, %c0_2] : memref<8x1xi32, #tpu.memory_space<vmem>>, vector<8x1xi32>
    %c0_3 = arith.constant 0 : index
    %c0_4 = arith.constant 0 : index
    %2 = vector.load %arg3[%c0_3, %c0_4] : memref<1x16xf32, #tpu.memory_space<vmem>>, vector<1x16xf32>
    %3 = tpu.iota {dimensions = array<i32: 1>} : vector<8x16xi32>
    %4 = vector.broadcast %1 : vector<8x1xi32> to vector<8x16xi32>
    %5 = arith.cmpi eq, %3, %4 : vector<8x16xi32>
    %cst = arith.constant dense<0xFF800000> : vector<8xf32>
    %6 = vector.multi_reduction <maximumf>, %0, %cst [1] : vector<8x16xf32> to vector<8xf32>
    %7 = vector.shape_cast %6 : vector<8xf32> to vector<8x1xf32>
    %8 = vector.broadcast %7 : vector<8x1xf32> to vector<8x16xf32>
    %9 = arith.subf %0, %8 : vector<8x16xf32>
    %10 = math.exp %9 : vector<8x16xf32>
    %cst_5 = arith.constant dense<0.000000e+00> : vector<8xf32>
    %11 = vector.multi_reduction <add>, %10, %cst_5 [1] : vector<8x16xf32> to vector<8xf32>
    %12 = vector.shape_cast %11 : vector<8xf32> to vector<8x1xf32>
    %13 = math.log %12 : vector<8x1xf32>
    %cst_6 = arith.constant 0.000000e+00 : f32
    %14 = vector.broadcast %cst_6 : f32 to vector<8x16xf32>
    %15 = arith.select %5, %9, %14 : vector<8x16xi1>, vector<8x16xf32>
    %cst_7 = arith.constant dense<0.000000e+00> : vector<8xf32>
    %16 = vector.multi_reduction <add>, %15, %cst_7 [1] : vector<8x16xf32> to vector<8xf32>
    %17 = vector.shape_cast %16 : vector<8xf32> to vector<8x1xf32>
    %18 = arith.subf %17, %13 : vector<8x1xf32>
    %cst_8 = arith.constant 0.000000e+00 : f32
    %19 = vector.broadcast %cst_8 : f32 to vector<8x1xf32>
    %20 = arith.subf %19, %18 : vector<8x1xf32>
    %21 = math.exp %18 : vector<8x1xf32>
    %cst_9 = arith.constant 0.000000e+00 : f32
    %22 = vector.shape_cast %2 : vector<1x16xf32> to vector<1x16xf32>
    %23 = vector.broadcast %22 : vector<1x16xf32> to vector<8x16xf32>
    %24 = vector.broadcast %cst_9 : f32 to vector<8x16xf32>
    %25 = arith.select %5, %23, %24 : vector<8x16xi1>, vector<8x16xf32>
    %cst_10 = arith.constant dense<0.000000e+00> : vector<8xf32>
    %26 = vector.multi_reduction <add>, %25, %cst_10 [1] : vector<8x16xf32> to vector<8xf32>
    %27 = vector.shape_cast %26 : vector<8xf32> to vector<8x1xf32>
    %28 = arith.mulf %27, %20 : vector<8x1xf32>
    %cst_11 = arith.constant 1.000000e+00 : f32
    %29 = vector.broadcast %cst_11 : f32 to vector<8x1xf32>
    %30 = arith.subf %29, %21 : vector<8x1xf32>
    %cst_12 = arith.constant 0.000000e+00 : f32
    %31 = vector.broadcast %cst_12 : f32 to vector<8x1xf32>
    %32 = arith.maximumf %30, %31 : vector<8x1xf32>
    %33 = arith.mulf %32, %32 : vector<8x1xf32>
    %34 = arith.mulf %33, %28 : vector<8x1xf32>
    %c8_i32 = arith.constant 8 : i32
    %35 = arith.muli %arg0, %c8_i32 : i32
    %36 = tpu.iota {dimensions = array<i32: 0>} : vector<8x1xi32>
    %37 = vector.broadcast %35 : i32 to vector<8x1xi32>
    %38 = arith.addi %37, %36 : vector<8x1xi32>
    %c8_i32_13 = arith.constant 8 : i32
    %39 = vector.broadcast %c8_i32_13 : i32 to vector<8x1xi32>
    %40 = arith.cmpi slt, %38, %39 : vector<8x1xi32>
    %cst_14 = arith.constant 0.000000e+00 : f32
    %41 = vector.broadcast %cst_14 : f32 to vector<8x1xf32>
    %42 = arith.select %40, %34, %41 : vector<8x1xi1>, vector<8x1xf32>
    %43 = vector.shape_cast %42 : vector<8x1xf32> to vector<1x8x1xf32>
    %cst_15 = arith.constant dense<0.000000e+00> : vector<1xf32>
    %44 = vector.multi_reduction <add>, %43, %cst_15 [1, 2] : vector<1x8x1xf32> to vector<1xf32>
    %45 = vector.shape_cast %44 : vector<1xf32> to vector<1x1x1xf32>
    %46 = vector.extract %45[0, 0, 0] : f32 from vector<1x1x1xf32>
    %47 = vector.broadcast %46 : f32 to vector<1x8x128xf32>
    %c0_16 = arith.constant 0 : index
    %c0_17 = arith.constant 0 : index
    %c0_18 = arith.constant 0 : index
    %48 = vector.load %arg4[%c0_16, %c0_17, %c0_18] : memref<1x8x128xf32, #tpu.memory_space<vmem>>, vector<1x8x128xf32>
    tpu.vector_store %arg4[%c0_16, %c0_17, %c0_18], %47 {strides = array<i32>} : memref<1x8x128xf32, #tpu.memory_space<vmem>>, vector<1x8x128xf32>,
    return
  }
  func.func @transform_0(%arg0: i32) -> (i32, i32) {
    %c0_i32 = arith.constant 0 : i32
    %c0_i32_0 = arith.constant 0 : i32
    return %arg0, %c0_i32 : i32, i32
  }
  func.func @transform_1(%arg0: i32) -> (i32, i32) {
    %c0_i32 = arith.constant 0 : i32
    %c0_i32_0 = arith.constant 0 : i32
    return %arg0, %c0_i32 : i32, i32
  }
  func.func @transform_2(%arg0: i32) -> (i32, i32) {
    %c0_i32 = arith.constant 0 : i32
    %c0_i32_0 = arith.constant 0 : i32
    %c0_i32_1 = arith.constant 0 : i32
    return %c0_i32, %c0_i32_0 : i32, i32
  }
  func.func @transform_3(%arg0: i32) -> (i32, i32, i32) {
    %c0_i32 = arith.constant 0 : i32
    %c0_i32_0 = arith.constant 0 : i32
    %c0_i32_1 = arith.constant 0 : i32
    return %arg0, %c0_i32, %c0_i32_0 : i32, i32, i32
  }
}

</mosaic_0001>

<bundles_post_ra>
// kernel: tpu_custom_call.1
= control target key start
LH: loop header
LB: loop body
LE: loop exit
PB: predicated region body
PF: predicated region fallthrough
CT: control target
= control target key end

     0   :  { %vm24_vm0 = vcmask 130048   ;;  %s165_s0 = inlined_call_operand.vmem [shape: f32[8,16], index: 0, kind: input, shape index: {}]   ;;  %s166_s1 = inlined_call_operand.vmem [shape: s32[8,1], index: 1, kind: input, shape index: {}]   ;;  %s167_s2 = inlined_call_operand.vmem [shape: f32[1,16], index: 2, kind: input, shape index: {}]   ;;  %s168_s3 = inlined_call_operand.hbm [shape: f32[1,8,128], index: 3, kind: output, shape index: {}]  }
   0x1   :  { %v15_v0 = vld [vmem:[%s165_s0] sm:$0xff] }
   0x2   :  { %8 = vsyncpa [#allocation3], 0  ;;  %v25_v1 = vsel %vm24_vm0, %v15_v0, -inf  ;;  %v127_v2 = vmov 0   ;;  %v16_v3 = vld [vmem:[%s166_s1] sm:$0xff]  ;;  %v18_v7 = vlaneseq  ;;  %vm66_vm2 = vcmask 7168  }
   0x3   :  { %98 = vset.pattern.permute.xlu0 %v127_v2  ;;  %v93_v12 = vld [vmem:[%s167_s2] ss:$0 sm:$0xff]  ;;  %s128_s1 = smov [#allocation2]  }
   0x4   :  { %26 = vmax.xlane.f32.xlu0 %v25_v1  ;;  %v19_v8 = vand.u32 127, %v18_v7  ;;  %s85_s2 = sshll.u32 %s128_s1, 4  ;;  %s86_s2 = int_to_ptr.vmem [resolvable:$true] %s85_s2 }
   0x5   :  { %s105_s18 = scalar_lea.vmem %s86_s2, 128  ;;  %p110_p1 = scmp.lt.s32.totalorder %s86_s2, %s86_s2 }
   0x6   :  { %p106_p0 = scmp.ne.s32.totalorder %s86_s2, %s105_s18  ;;  %p111_p2 = scmp.lt.s32.totalorder %s105_s18, %s105_s18 }
   0x8   :  { %p112_p3 = por %p111_p2, %p110_p1 }
   0xa   :  { %p113_p4 = pnand %p112_p3, %p106_p0 }
  0x1a   :  { %21 = vperm.xlu0 %98, %v16_v3  }
  0x8d   :  { %v27_v4 = vpop.xlane.xlu0 %26 }
  0x8e   :  { %v28_v5 = vsub.f32 %v15_v0, %v27_v4 }
  0x90   :  { %v29_v6 = vmul.f32 1.442695, %v28_v5 }
  0x92   :  { %99 = vpow2.f32 %v29_v6 }
  0x95   :  { %v22_v9 = vpop.permute.xlu0 %21 }
  0x96   :  { %vm23_vm1 = vcmp.eq.s32.totalorder %v19_v8, %v22_v9 }
  0x97   :  { %v36_v13 = vsel %vm23_vm1, %v28_v5, 0.0  ;;  %v50_v14 = vsel %vm23_vm1, %v93_v12, 0.0 }
  0x98   :  { %v37_v15 = vsel %vm24_vm0, %v36_v13, 0.0  ;;  %v51_v16 = vsel %vm24_vm0, %v50_v14, 0.0 }
  0x9f   :  { %v100_v10 = vpop.eup %99 }
  0xa0   :  { %v31_v11 = vsel %vm24_vm0, %v100_v10, 0.0 }
  0xa1   :  { %32 = vadd.xlane.f32.xlu1 %v31_v11 }
  0xa5   :  { %38 = vadd.xlane.f32.xlu1 %v37_v15 }
  0xa9   :  { %52 = vadd.xlane.f32.xlu1 %v51_v16 }
 0x12a   :  { %v33_v17 = vpop.xlane.xlu1 %32 }
 0x12b   :  { %101 = vlog2.f32 %v33_v17 }
 0x12e   :  { %v39_v20 = vpop.xlane.xlu1 %38 }
 0x132   :  { %v53_v27 = vpop.xlane.xlu1 %52 }
 0x138   :  { %v102_v18 = vpop.eup %101 }
 0x139   :  { %v35_v19 = vmul.f32 0.6931472, %v102_v18 }
 0x13b   :  { %v40_v21 = vsub.f32 %v39_v20, %v35_v19 }
 0x13d   :  { %v42_v22 = vmul.f32 1.442695, %v40_v21  ;;  %v41_v24 = vsub.f32 0.0, %v40_v21 }
 0x13f   :  { %103 = vpow2.f32 %v42_v22  ;;  %v54_v28 = vmul.f32 %v53_v27, %v41_v24 }
 0x14c   :  { %v104_v23 = vpop.eup %103 }
 0x14d   :  { %v55_v25 = vsub.f32 1.0, %v104_v23 }
 0x14f   :  { %v56_v26 = vmax.f32 %v55_v25, 0.0 }
 0x151   :  { %v57_v29 = vmul.f32 %v56_v26, %v56_v26 }
 0x153   :  { %v58_v30 = vmul.f32 %v57_v29, %v54_v28 }
 0x155   :  { %v67_v31 = vsel %vm66_vm2, %v58_v30, 0.0 }
 0x156   :  { %68 = vadd.xlane.f32.xlu1 %v67_v31 }
 0x1df   :  { %v69_v32 = vpop.xlane.xlu1 %68 }
 0x1e0   :  { %v70_v33 = vrot.slane %v69_v32, 4 }
 0x1e2   :  { %v71_v34 = vadd.f32 %v70_v33, %v69_v32 }
 0x1e4   :  { %v72_v35 = vrot.slane %v71_v34, 2 }
 0x1e6   :  { %v73_v36 = vadd.f32 %v72_v35, %v71_v34 }
 0x1e8   :  { %v74_v37 = vrot.slane %v73_v36, 1 }
 0x1ea   :  { %v75_v38 = vadd.f32 %v74_v37, %v73_v36 }
 0x1ec   :  { %94 = vpush %v75_v38 }
 0x21d   :  { %s95_s17 = spop %94 }
 0x21e   :  { %v77_v39 = vstv %s95_s17 }
 0x21f   :  { %78 = vst [vmem:[#allocation2] sm:$0xff] %v77_v39 }
 0x220   :  { %116 = shalt.err (!%p113_p4)
}
 0x221   :  { %88 = dma.vmem_to_hbm [thread:$0]  %s86_s2, 128, %s168_s3, [#allocation3]  }
 0x222   :  { %125 = dma.done.wait [#allocation3], 128  }
 0x223   :  { %126 = vsyncadd [#allocation3], 4294967168 }
 0x224   :  { %92 = vsyncpa [#allocation3], 1 }

</bundles_post_ra>
